<compile_context>
chip_gen: v7x
topology: tpu7x:2x2x1
jax: 0.10.0
libtpu: 0.0.40
codegen_flags: <defaults>
</compile_context>

<pallas_src>
import math
import functools

import jax
import jax.numpy as jnp
from jax.experimental import pallas as pl
from jax.experimental.pallas import tpu as pltpu


def _mha_kernel(x_ref, wq_ref, wk_ref, wv_ref, bq_ref, bk_ref, bv_ref,
                wo_ref, bo_ref, o_ref, q_sc, m_sc, l_sc, acc_sc, *, tkv):
    """One (batch, head, kv-chunk) grid step."""
    L, d_k = q_sc.shape
    D = x_ref.shape[2]
    h = pl.program_id(1)
    kv = pl.program_id(2)
    nkv = pl.num_programs(2)

    # --- Seed the resident (L, D) output accumulator with b_o, once per b. ---
    @pl.when(jnp.logical_and(h == 0, kv == 0))
    def _init_out():
        o_ref[0] = jnp.broadcast_to(bo_ref[...], (L, D)).astype(o_ref.dtype)

    # --- Per-head init: reset online-softmax state, project this head's Q. ---
    # Scale 1/sqrt(d_k) is already folded into wq/bq by the wrapper.
    @pl.when(kv == 0)
    def _init_head():
        m_sc[...] = jnp.full((L, 1), -jnp.inf, jnp.float32)
        l_sc[...] = jnp.zeros((L, 1), jnp.float32)
        acc_sc[...] = jnp.zeros((L, d_k), jnp.float32)
        q = jnp.dot(x_ref[0].astype(jnp.bfloat16), wq_ref[0],
                    preferred_element_type=jnp.float32) + bq_ref[0]
        q_sc[...] = q.astype(jnp.bfloat16)

    # --- Project K / V for this KV chunk (rows kv*tkv .. kv*tkv+tkv of x). ---
    start = pl.multiple_of(kv * tkv, tkv)
    x_kv = x_ref[0, pl.ds(start, tkv), :].astype(jnp.bfloat16)      # (tkv, D)
    k = jnp.dot(x_kv, wk_ref[0], preferred_element_type=jnp.float32) + bk_ref[0]
    v = jnp.dot(x_kv, wv_ref[0], preferred_element_type=jnp.float32) + bv_ref[0]

    # --- Scores for this chunk: (L, tkv), scale pre-folded into Q. ---
    s = jnp.einsum("qd,kd->qk", q_sc[...], k.astype(jnp.bfloat16),
                   preferred_element_type=jnp.float32)

    # --- Online softmax update (f32). ---
    m_prev = m_sc[...]
    m_new = jnp.maximum(m_prev, jnp.max(s, axis=-1, keepdims=True))
    alpha = jnp.exp(m_prev - m_new)
    p = jnp.exp(s - m_new)
    l_sc[...] = alpha * l_sc[...] + jnp.sum(p, axis=-1, keepdims=True)
    acc_sc[...] = alpha * acc_sc[...] + jnp.dot(
        p.astype(jnp.bfloat16), v.astype(jnp.bfloat16),
        preferred_element_type=jnp.float32)
    m_sc[...] = m_new

    # --- Last KV chunk of this head: normalize + fold the head's output
    #     projection slab into the shared output block (no (H, L, D) temp). ---
    @pl.when(kv == nkv - 1)
    def _finalize_head():
        ctx = acc_sc[...] * pl.reciprocal(l_sc[...], approx=True)   # (L, d_k)
        head_out = jnp.dot(ctx.astype(jnp.bfloat16), wo_ref[0],
                           preferred_element_type=jnp.float32)      # (L, D)
        o_ref[0] += head_out.astype(o_ref.dtype)


def _pick_kv_tile(L):
    for cand in (512, 256, 128, 64, 32, 16, 8):
        if L % cand == 0:
            return cand
    return L


def multi_head_attention(x, params, num_heads):
    """x: [B, L, D] float32.  params: PyTorch-layout weights.  Returns [B, L, D]."""
    B, L, D = x.shape
    assert D % num_heads == 0
    H = num_heads
    d_k = D // num_heads
    scale = 1.0 / math.sqrt(d_k)

    tkv = _pick_kv_tile(L)
    nkv = L // tkv

    f32, bf16 = jnp.float32, jnp.bfloat16

    # One-time layout / dtype work hoisted out of the kernel:
    #  - PyTorch (out, in) weights -> (in, out), split into head-major slabs,
    #  - 1/sqrt(d_k) folded into W_q and b_q (no in-kernel score scaling),
    #  - matmul weights cast to bf16 (f32 MXU accumulation inside the kernel),
    #  - biases kept f32, lane-major.
    def head_cols(w):  # (D_out, D_in) -> (H, D_in, d_k), head-major columns
        return jnp.transpose(w.T.reshape(D, H, d_k), (1, 0, 2))

    w_q = (head_cols(params["W_q"]) * scale).astype(bf16)            # (H, D, d_k)
    w_k = head_cols(params["W_k"]).astype(bf16)                      # (H, D, d_k)
    w_v = head_cols(params["W_v"]).astype(bf16)                      # (H, D, d_k)
    w_o = params["W_o"].T.reshape(H, d_k, D).astype(bf16)            # (H, d_k, D)
    b_q = (params["b_q"] * scale).reshape(H, 1, d_k).astype(f32)
    b_k = params["b_k"].reshape(H, 1, d_k).astype(f32)
    b_v = params["b_v"].reshape(H, 1, d_k).astype(f32)
    b_o = params["b_o"].reshape(1, D).astype(f32)

    # Explicit VMEM budget sized from the chosen tiles (with headroom),
    # clamped so it is safe on v5e/v6e (128 MiB) and v7x (64 MiB physical).
    est_bytes = (
        2 * 2 * (L * D * 4)                          # x in + out blocks, 2x buffered
        + 2 * (3 * D * d_k + d_k * D) * 2            # per-head bf16 weight slabs, 2x
        + 2 * (3 * d_k + D) * 4                      # f32 biases, 2x
        + (L * d_k) * (2 + 4) + 2 * (L * 8) * 4      # q/acc/m/l scratch (padded)
        + 6 * L * tkv * 4                            # scores/probs temporaries
    )
    vmem_limit = int(min(max(4 * est_bytes, 32 * 1024 * 1024), 48 * 1024 * 1024))

    kernel = functools.partial(_mha_kernel, tkv=tkv)

    return pl.pallas_call(
        kernel,
        out_shape=jax.ShapeDtypeStruct((B, L, D), x.dtype),
        grid_spec=pltpu.PrefetchScalarGridSpec(
            num_scalar_prefetch=0,
            grid=(B, H, nkv),
            in_specs=[
                pl.BlockSpec((1, L, D), lambda b, h, k: (b, 0, 0)),       # x
                pl.BlockSpec((1, D, d_k), lambda b, h, k: (h, 0, 0)),     # W_q (head h)
                pl.BlockSpec((1, D, d_k), lambda b, h, k: (h, 0, 0)),     # W_k (head h)
                pl.BlockSpec((1, D, d_k), lambda b, h, k: (h, 0, 0)),     # W_v (head h)
                pl.BlockSpec((1, 1, d_k), lambda b, h, k: (h, 0, 0)),     # b_q
                pl.BlockSpec((1, 1, d_k), lambda b, h, k: (h, 0, 0)),     # b_k
                pl.BlockSpec((1, 1, d_k), lambda b, h, k: (h, 0, 0)),     # b_v
                pl.BlockSpec((1, d_k, D), lambda b, h, k: (h, 0, 0)),     # W_o (head h)
                pl.BlockSpec((1, D), lambda b, h, k: (0, 0)),             # b_o
            ],
            out_specs=pl.BlockSpec((1, L, D), lambda b, h, k: (b, 0, 0)),
            scratch_shapes=[
                pltpu.VMEM((L, d_k), bf16),    # Q for the current head
                pltpu.VMEM((L, 1), f32),       # running max
                pltpu.VMEM((L, 1), f32),       # running denom
                pltpu.VMEM((L, d_k), f32),     # context accumulator
            ],
        ),
        compiler_params=pltpu.CompilerParams(
            dimension_semantics=("parallel", "arbitrary", "arbitrary"),
            vmem_limit_bytes=vmem_limit),
    )(x, w_q, w_k, w_v, b_q, b_k, b_v, w_o, b_o)


def _reference(x, params, num_heads):
    """Pure-JAX f32 reference mirroring the PyTorch forward exactly."""
    B, L, D = x.shape
    d_k = D // num_heads

    def lin(x, w, b):
        return jnp.einsum("bld,od->blo", x, w) + b

    Q = lin(x, params["W_q"], params["b_q"]).reshape(B, L, num_heads, d_k).transpose(0, 2, 1, 3)
    K = lin(x, params["W_k"], params["b_k"]).reshape(B, L, num_heads, d_k).transpose(0, 2, 1, 3)
    V = lin(x, params["W_v"], params["b_v"]).reshape(B, L, num_heads, d_k).transpose(0, 2, 1, 3)
    scores = jnp.einsum("bhqd,bhkd->bhqk", Q, K) / math.sqrt(d_k)
    attn = jax.nn.softmax(scores, axis=-1)
    out = jnp.einsum("bhqk,bhkd->bhqd", attn, V)
    out = out.transpose(0, 2, 1, 3).reshape(B, L, D)
    return lin(out, params["W_o"], params["b_o"])


if __name__ == "__main__":
    B, L, D, H = 2, 8, 32, 4

    key = jax.random.PRNGKey(0)
    keys = jax.random.split(key, 9)
    bound = 1.0 / math.sqrt(D)   # PyTorch Linear default init range

    params = {
        "W_q": jax.random.uniform(keys[0], (D, D), jnp.float32, -bound, bound),
        "b_q": jax.random.uniform(keys[1], (D,), jnp.float32, -bound, bound),
        "W_k": jax.random.uniform(keys[2], (D, D), jnp.float32, -bound, bound),
        "b_k": jax.random.uniform(keys[3], (D,), jnp.float32, -bound, bound),
        "W_v": jax.random.uniform(keys[4], (D, D), jnp.float32, -bound, bound),
        "b_v": jax.random.uniform(keys[5], (D,), jnp.float32, -bound, bound),
        "W_o": jax.random.uniform(keys[6], (D, D), jnp.float32, -bound, bound),
        "b_o": jax.random.uniform(keys[7], (D,), jnp.float32, -bound, bound),
    }
    x = jax.random.normal(keys[8], (B, L, D), jnp.float32)

    out = multi_head_attention(x, params, H)
    out = jax.block_until_ready(out)

    ref = _reference(x, params, H)
    assert out.shape == (B, L, D)
    # bf16 matmul inputs (f32 accumulation) + approx EUP reciprocal ->
    # loosened tolerance vs the pure-f32 reference.
    assert jnp.allclose(out, ref, atol=5e-2, rtol=5e-2), "mismatch vs reference"

    print("KERNEL_OK")
</pallas_src>

<mosaic_0001>
module attributes {stable_mosaic.version = 11 : i64} {
  func.func @_mha_kernel(%arg0: i32, %arg1: i32, %arg2: i32, %arg3: memref<1x8x32xf32, #tpu.memory_space<vmem>>, %arg4: memref<1x32x8xbf16, #tpu.memory_space<vmem>>, %arg5: memref<1x32x8xbf16, #tpu.memory_space<vmem>>, %arg6: memref<1x32x8xbf16, #tpu.memory_space<vmem>>, %arg7: memref<1x1x8xf32, #tpu.memory_space<vmem>>, %arg8: memref<1x1x8xf32, #tpu.memory_space<vmem>>, %arg9: memref<1x1x8xf32, #tpu.memory_space<vmem>>, %arg10: memref<1x8x32xbf16, #tpu.memory_space<vmem>>, %arg11: memref<1x32xf32, #tpu.memory_space<vmem>>, %arg12: memref<1x8x32xf32, #tpu.memory_space<vmem>>, %arg13: memref<8x8xbf16, #tpu.memory_space<vmem>>, %arg14: memref<8x1xf32, #tpu.memory_space<vmem>>, %arg15: memref<8x1xf32, #tpu.memory_space<vmem>>, %arg16: memref<8x8xf32, #tpu.memory_space<vmem>>) attributes {dimension_semantics = [#tpu.dimension_semantics<parallel>, #tpu.dimension_semantics<arbitrary>, #tpu.dimension_semantics<arbitrary>], iteration_bounds = array<i64: 2, 4, 1>, scalar_prefetch = 0 : i64, scratch_operands = 4 : i64, tpu.core_type = #tpu.core_type<tc>, window_params = [{transform_indices = @transform_0, window_bounds = array<i64: 1, 8, 32>}, {transform_indices = @transform_1, window_bounds = array<i64: 1, 32, 8>}, {transform_indices = @transform_2, window_bounds = array<i64: 1, 32, 8>}, {transform_indices = @transform_3, window_bounds = array<i64: 1, 32, 8>}, {transform_indices = @transform_4, window_bounds = array<i64: 1, 1, 8>}, {transform_indices = @transform_5, window_bounds = array<i64: 1, 1, 8>}, {transform_indices = @transform_6, window_bounds = array<i64: 1, 1, 8>}, {transform_indices = @transform_7, window_bounds = array<i64: 1, 8, 32>}, {pipeline_mode = #tpu.pipeline_mode<synchronous>, transform_indices = @transform_8, window_bounds = array<i64: 1, 32>}, {transform_indices = @transform_9, window_bounds = array<i64: 1, 8, 32>}]} {
    %c0_i32 = arith.constant 0 : i32
    %0 = arith.cmpi eq, %arg1, %c0_i32 : i32
    %c0_i32_0 = arith.constant 0 : i32
    %1 = arith.cmpi eq, %arg2, %c0_i32_0 : i32
    %2 = arith.andi %0, %1 : i1
    %3 = arith.extui %2 : i1 to i32
    %c0_i32_1 = arith.constant 0 : i32
    %4 = arith.cmpi ne, %3, %c0_i32_1 : i32
    scf.if %4 {
      %c0_38 = arith.constant 0 : index
      %c0_39 = arith.constant 0 : index
      %58 = vector.load %arg11[%c0_38, %c0_39] : memref<1x32xf32, #tpu.memory_space<vmem>>, vector<1x32xf32>
      %59 = vector.shape_cast %58 : vector<1x32xf32> to vector<1x32xf32>
      %60 = vector.broadcast %59 : vector<1x32xf32> to vector<8x32xf32>
      %c0_40 = arith.constant 0 : index
      %c0_41 = arith.constant 0 : index
      %c0_42 = arith.constant 0 : index
      %61 = vector.load %arg12[%c0_40, %c0_41, %c0_42] : memref<1x8x32xf32, #tpu.memory_space<vmem>>, vector<1x8x32xf32>
      %62 = vector.shape_cast %61 : vector<1x8x32xf32> to vector<8x32xf32>
      %63 = vector.shape_cast %60 : vector<8x32xf32> to vector<1x8x32xf32>
      tpu.vector_store %arg12[%c0_40, %c0_41, %c0_42], %63 {strides = array<i32>} : memref<1x8x32xf32, #tpu.memory_space<vmem>>, vector<1x8x32xf32>,
    } else {
    }
    %c0_i32_2 = arith.constant 0 : i32
    %5 = arith.cmpi eq, %arg2, %c0_i32_2 : i32
    %6 = arith.extui %5 : i1 to i32
    %c0_i32_3 = arith.constant 0 : i32
    %7 = arith.cmpi ne, %6, %c0_i32_3 : i32
    scf.if %7 {
      %cst_38 = arith.constant 0xFF800000 : f32
      %58 = vector.broadcast %cst_38 : f32 to vector<8x1xf32>
      %c0_39 = arith.constant 0 : index
      %c0_40 = arith.constant 0 : index
      %59 = vector.load %arg14[%c0_39, %c0_40] : memref<8x1xf32, #tpu.memory_space<vmem>>, vector<8x1xf32>
      tpu.vector_store %arg14[%c0_39, %c0_40], %58 {strides = array<i32>} : memref<8x1xf32, #tpu.memory_space<vmem>>, vector<8x1xf32>,
      %cst_41 = arith.constant 0.000000e+00 : f32
      %60 = vector.broadcast %cst_41 : f32 to vector<8x1xf32>
      %c0_42 = arith.constant 0 : index
      %c0_43 = arith.constant 0 : index
      %61 = vector.load %arg15[%c0_42, %c0_43] : memref<8x1xf32, #tpu.memory_space<vmem>>, vector<8x1xf32>
      tpu.vector_store %arg15[%c0_42, %c0_43], %60 {strides = array<i32>} : memref<8x1xf32, #tpu.memory_space<vmem>>, vector<8x1xf32>,
      %cst_44 = arith.constant 0.000000e+00 : f32
      %62 = vector.broadcast %cst_44 : f32 to vector<8x8xf32>
      %c0_45 = arith.constant 0 : index
      %c0_46 = arith.constant 0 : index
      %63 = vector.load %arg16[%c0_45, %c0_46] : memref<8x8xf32, #tpu.memory_space<vmem>>, vector<8x8xf32>
      tpu.vector_store %arg16[%c0_45, %c0_46], %62 {strides = array<i32>} : memref<8x8xf32, #tpu.memory_space<vmem>>, vector<8x8xf32>,
      %c0_47 = arith.constant 0 : index
      %c0_48 = arith.constant 0 : index
      %c0_49 = arith.constant 0 : index
      %64 = vector.load %arg3[%c0_47, %c0_48, %c0_49] : memref<1x8x32xf32, #tpu.memory_space<vmem>>, vector<1x8x32xf32>
      %65 = vector.shape_cast %64 : vector<1x8x32xf32> to vector<8x32xf32>
      %66 = arith.truncf %65 : vector<8x32xf32> to vector<8x32xbf16>
      %c0_50 = arith.constant 0 : index
      %c0_51 = arith.constant 0 : index
      %c0_52 = arith.constant 0 : index
      %67 = vector.load %arg4[%c0_50, %c0_51, %c0_52] : memref<1x32x8xbf16, #tpu.memory_space<vmem>>, vector<1x32x8xbf16>
      %68 = vector.shape_cast %67 : vector<1x32x8xbf16> to vector<32x8xbf16>
      %cst_53 = arith.constant dense<0.000000e+00> : vector<8x8xf32>
      %69 = tpu.matmul %66, %68, %cst_53 {dimension_numbers = #tpu.dot_dimension_numbers<[1], [0], [0], [1], [0, 0, 1, 1], [], []>} : vector<8x32xbf16>, vector<32x8xbf16>, vector<8x8xf32> -> vector<8x8xf32>
      %c0_54 = arith.constant 0 : index
      %c0_55 = arith.constant 0 : index
      %c0_56 = arith.constant 0 : index
      %70 = vector.load %arg7[%c0_54, %c0_55, %c0_56] : memref<1x1x8xf32, #tpu.memory_space<vmem>>, vector<1x1x8xf32>
      %71 = vector.shape_cast %70 : vector<1x1x8xf32> to vector<1x8xf32>
      %72 = vector.broadcast %71 : vector<1x8xf32> to vector<8x8xf32>
      %73 = arith.addf %69, %72 : vector<8x8xf32>
      %74 = arith.truncf %73 : vector<8x8xf32> to vector<8x8xbf16>
      %c0_57 = arith.constant 0 : index
      %c0_58 = arith.constant 0 : index
      %75 = vector.load %arg13[%c0_57, %c0_58] : memref<8x8xbf16, #tpu.memory_space<vmem>>, vector<8x8xbf16>
      tpu.vector_store %arg13[%c0_57, %c0_58], %74 {strides = array<i32>} : memref<8x8xbf16, #tpu.memory_space<vmem>>, vector<8x8xbf16>,
    } else {
    }
    %c8_i32 = arith.constant 8 : i32
    %8 = arith.muli %arg2, %c8_i32 : i32
    %9 = tpu.assume_multiple %8, 8 : i32
    %c0 = arith.constant 0 : index
    %10 = arith.index_cast %9 : i32 to index
    %c0_4 = arith.constant 0 : index
    %11 = vector.load %arg3[%c0, %10, %c0_4] : memref<1x8x32xf32, #tpu.memory_space<vmem>>, vector<1x8x32xf32>
    %12 = vector.shape_cast %11 : vector<1x8x32xf32> to vector<8x32xf32>
    %13 = arith.truncf %12 : vector<8x32xf32> to vector<8x32xbf16>
    %c0_5 = arith.constant 0 : index
    %c0_6 = arith.constant 0 : index
    %c0_7 = arith.constant 0 : index
    %14 = vector.load %arg5[%c0_5, %c0_6, %c0_7] : memref<1x32x8xbf16, #tpu.memory_space<vmem>>, vector<1x32x8xbf16>
    %15 = vector.shape_cast %14 : vector<1x32x8xbf16> to vector<32x8xbf16>
    %cst = arith.constant dense<0.000000e+00> : vector<8x8xf32>
    %16 = tpu.matmul %13, %15, %cst {dimension_numbers = #tpu.dot_dimension_numbers<[1], [0], [0], [1], [0, 0, 1, 1], [], []>} : vector<8x32xbf16>, vector<32x8xbf16>, vector<8x8xf32> -> vector<8x8xf32>
    %c0_8 = arith.constant 0 : index
    %c0_9 = arith.constant 0 : index
    %c0_10 = arith.constant 0 : index
    %17 = vector.load %arg8[%c0_8, %c0_9, %c0_10] : memref<1x1x8xf32, #tpu.memory_space<vmem>>, vector<1x1x8xf32>
    %18 = vector.shape_cast %17 : vector<1x1x8xf32> to vector<1x8xf32>
    %19 = vector.broadcast %18 : vector<1x8xf32> to vector<8x8xf32>
    %20 = arith.addf %16, %19 : vector<8x8xf32>
    %c0_11 = arith.constant 0 : index
    %c0_12 = arith.constant 0 : index
    %c0_13 = arith.constant 0 : index
    %21 = vector.load %arg6[%c0_11, %c0_12, %c0_13] : memref<1x32x8xbf16, #tpu.memory_space<vmem>>, vector<1x32x8xbf16>
    %22 = vector.shape_cast %21 : vector<1x32x8xbf16> to vector<32x8xbf16>
    %cst_14 = arith.constant dense<0.000000e+00> : vector<8x8xf32>
    %23 = tpu.matmul %13, %22, %cst_14 {dimension_numbers = #tpu.dot_dimension_numbers<[1], [0], [0], [1], [0, 0, 1, 1], [], []>} : vector<8x32xbf16>, vector<32x8xbf16>, vector<8x8xf32> -> vector<8x8xf32>
    %c0_15 = arith.constant 0 : index
    %c0_16 = arith.constant 0 : index
    %c0_17 = arith.constant 0 : index
    %24 = vector.load %arg9[%c0_15, %c0_16, %c0_17] : memref<1x1x8xf32, #tpu.memory_space<vmem>>, vector<1x1x8xf32>
    %25 = vector.shape_cast %24 : vector<1x1x8xf32> to vector<1x8xf32>
    %26 = vector.broadcast %25 : vector<1x8xf32> to vector<8x8xf32>
    %27 = arith.addf %23, %26 : vector<8x8xf32>
    %c0_18 = arith.constant 0 : index
    %c0_19 = arith.constant 0 : index
    %28 = vector.load %arg13[%c0_18, %c0_19] : memref<8x8xbf16, #tpu.memory_space<vmem>>, vector<8x8xbf16>
    %29 = arith.truncf %20 : vector<8x8xf32> to vector<8x8xbf16>
    "tpu.trace_start"() <{level = 10 : i32, message = "qd,kd->qk"}> : () -> ()
    %cst_20 = arith.constant dense<0.000000e+00> : vector<8x8xf32>
    %30 = tpu.matmul %28, %29, %cst_20 {dimension_numbers = #tpu.dot_dimension_numbers<[1], [1], [0], [0], [0, 0, 1, 0], [], []>} : vector<8x8xbf16>, vector<8x8xbf16>, vector<8x8xf32> -> vector<8x8xf32>
    "tpu.trace_stop"() : () -> ()
    %c0_21 = arith.constant 0 : index
    %c0_22 = arith.constant 0 : index
    %31 = vector.load %arg14[%c0_21, %c0_22] : memref<8x1xf32, #tpu.memory_space<vmem>>, vector<8x1xf32>
    %cst_23 = arith.constant dense<0xFF800000> : vector<8xf32>
    %32 = vector.multi_reduction <maximumf>, %30, %cst_23 [1] : vector<8x8xf32> to vector<8xf32>
    %33 = vector.shape_cast %32 : vector<8xf32> to vector<8x1xf32>
    %34 = arith.maximumf %31, %33 : vector<8x1xf32>
    %35 = arith.subf %31, %34 : vector<8x1xf32>
    %36 = math.exp %35 : vector<8x1xf32>
    %37 = vector.broadcast %34 : vector<8x1xf32> to vector<8x8xf32>
    %38 = arith.subf %30, %37 : vector<8x8xf32>
    %39 = math.exp %38 : vector<8x8xf32>
    %c0_24 = arith.constant 0 : index
    %c0_25 = arith.constant 0 : index
    %40 = vector.load %arg15[%c0_24, %c0_25] : memref<8x1xf32, #tpu.memory_space<vmem>>, vector<8x1xf32>
    %41 = arith.mulf %36, %40 : vector<8x1xf32>
    %cst_26 = arith.constant dense<0.000000e+00> : vector<8xf32>
    %42 = vector.multi_reduction <add>, %39, %cst_26 [1] : vector<8x8xf32> to vector<8xf32>
    %43 = vector.shape_cast %42 : vector<8xf32> to vector<8x1xf32>
    %44 = arith.addf %41, %43 : vector<8x1xf32>
    %c0_27 = arith.constant 0 : index
    %c0_28 = arith.constant 0 : index
    %45 = vector.load %arg15[%c0_27, %c0_28] : memref<8x1xf32, #tpu.memory_space<vmem>>, vector<8x1xf32>
    tpu.vector_store %arg15[%c0_27, %c0_28], %44 {strides = array<i32>} : memref<8x1xf32, #tpu.memory_space<vmem>>, vector<8x1xf32>,
    %c0_29 = arith.constant 0 : index
    %c0_30 = arith.constant 0 : index
    %46 = vector.load %arg16[%c0_29, %c0_30] : memref<8x8xf32, #tpu.memory_space<vmem>>, vector<8x8xf32>
    %47 = vector.broadcast %36 : vector<8x1xf32> to vector<8x8xf32>
    %48 = arith.mulf %47, %46 : vector<8x8xf32>
    %49 = arith.truncf %39 : vector<8x8xf32> to vector<8x8xbf16>
    %50 = arith.truncf %27 : vector<8x8xf32> to vector<8x8xbf16>
    %cst_31 = arith.constant dense<0.000000e+00> : vector<8x8xf32>
    %51 = tpu.matmul %49, %50, %cst_31 {dimension_numbers = #tpu.dot_dimension_numbers<[1], [0], [0], [1], [0, 0, 1, 1], [], []>} : vector<8x8xbf16>, vector<8x8xbf16>, vector<8x8xf32> -> vector<8x8xf32>
    %52 = arith.addf %48, %51 : vector<8x8xf32>
    %c0_32 = arith.constant 0 : index
    %c0_33 = arith.constant 0 : index
    %53 = vector.load %arg16[%c0_32, %c0_33] : memref<8x8xf32, #tpu.memory_space<vmem>>, vector<8x8xf32>
    tpu.vector_store %arg16[%c0_32, %c0_33], %52 {strides = array<i32>} : memref<8x8xf32, #tpu.memory_space<vmem>>, vector<8x8xf32>,
    %c0_34 = arith.constant 0 : index
    %c0_35 = arith.constant 0 : index
    %54 = vector.load %arg14[%c0_34, %c0_35] : memref<8x1xf32, #tpu.memory_space<vmem>>, vector<8x1xf32>
    tpu.vector_store %arg14[%c0_34, %c0_35], %34 {strides = array<i32>} : memref<8x1xf32, #tpu.memory_space<vmem>>, vector<8x1xf32>,
    %c0_i32_36 = arith.constant 0 : i32
    %55 = arith.cmpi eq, %arg2, %c0_i32_36 : i32
    %56 = arith.extui %55 : i1 to i32
    %c0_i32_37 = arith.constant 0 : i32
    %57 = arith.cmpi ne, %56, %c0_i32_37 : i32
    scf.if %57 {
      %c0_38 = arith.constant 0 : index
      %c0_39 = arith.constant 0 : index
      %58 = vector.load %arg16[%c0_38, %c0_39] : memref<8x8xf32, #tpu.memory_space<vmem>>, vector<8x8xf32>
      %c0_40 = arith.constant 0 : index
      %c0_41 = arith.constant 0 : index
      %59 = vector.load %arg15[%c0_40, %c0_41] : memref<8x1xf32, #tpu.memory_space<vmem>>, vector<8x1xf32>
      %60 = tpu.reciprocal %59 {approx = true} : vector<8x1xf32> -> vector<8x1xf32>
      %61 = vector.broadcast %60 : vector<8x1xf32> to vector<8x8xf32>
      %62 = arith.mulf %58, %61 : vector<8x8xf32>
      %63 = arith.truncf %62 : vector<8x8xf32> to vector<8x8xbf16>
      %c0_42 = arith.constant 0 : index
      %c0_43 = arith.constant 0 : index
      %c0_44 = arith.constant 0 : index
      %64 = vector.load %arg10[%c0_42, %c0_43, %c0_44] : memref<1x8x32xbf16, #tpu.memory_space<vmem>>, vector<1x8x32xbf16>
      %65 = vector.shape_cast %64 : vector<1x8x32xbf16> to vector<8x32xbf16>
      %cst_45 = arith.constant dense<0.000000e+00> : vector<8x32xf32>
      %66 = tpu.matmul %63, %65, %cst_45 {dimension_numbers = #tpu.dot_dimension_numbers<[1], [0], [0], [1], [0, 0, 1, 1], [], []>} : vector<8x8xbf16>, vector<8x32xbf16>, vector<8x32xf32> -> vector<8x32xf32>
      %c0_46 = arith.constant 0 : index
      %c0_47 = arith.constant 0 : index
      %c0_48 = arith.constant 0 : index
      %67 = vector.load %arg12[%c0_46, %c0_47, %c0_48] : memref<1x8x32xf32, #tpu.memory_space<vmem>>, vector<1x8x32xf32>
      %68 = vector.shape_cast %67 : vector<1x8x32xf32> to vector<8x32xf32>
      %69 = arith.addf %68, %66 : vector<8x32xf32>
      %c0_49 = arith.constant 0 : index
      %c0_50 = arith.constant 0 : index
      %c0_51 = arith.constant 0 : index
      %70 = vector.load %arg12[%c0_49, %c0_50, %c0_51] : memref<1x8x32xf32, #tpu.memory_space<vmem>>, vector<1x8x32xf32>
      %71 = vector.shape_cast %70 : vector<1x8x32xf32> to vector<8x32xf32>
      %72 = vector.shape_cast %69 : vector<8x32xf32> to vector<1x8x32xf32>
      tpu.vector_store %arg12[%c0_49, %c0_50, %c0_51], %72 {strides = array<i32>} : memref<1x8x32xf32, #tpu.memory_space<vmem>>, vector<1x8x32xf32>,
    } else {
    }
    return
  }
  func.func @transform_0(%arg0: i32, %arg1: i32, %arg2: i32) -> (i32, i32, i32) {
    %c0_i32 = arith.constant 0 : i32
    %c0_i32_0 = arith.constant 0 : i32
    %c0_i32_1 = arith.constant 0 : i32
    return %arg0, %c0_i32, %c0_i32_0 : i32, i32, i32
  }
  func.func @transform_1(%arg0: i32, %arg1: i32, %arg2: i32) -> (i32, i32, i32) {
    %c0_i32 = arith.constant 0 : i32
    %c0_i32_0 = arith.constant 0 : i32
    %c0_i32_1 = arith.constant 0 : i32
    return %arg1, %c0_i32, %c0_i32_0 : i32, i32, i32
  }
  func.func @transform_2(%arg0: i32, %arg1: i32, %arg2: i32) -> (i32, i32, i32) {
    %c0_i32 = arith.constant 0 : i32
    %c0_i32_0 = arith.constant 0 : i32
    %c0_i32_1 = arith.constant 0 : i32
    return %arg1, %c0_i32, %c0_i32_0 : i32, i32, i32
  }
  func.func @transform_3(%arg0: i32, %arg1: i32, %arg2: i32) -> (i32, i32, i32) {
    %c0_i32 = arith.constant 0 : i32
    %c0_i32_0 = arith.constant 0 : i32
    %c0_i32_1 = arith.constant 0 : i32
    return %arg1, %c0_i32, %c0_i32_0 : i32, i32, i32
  }
  func.func @transform_4(%arg0: i32, %arg1: i32, %arg2: i32) -> (i32, i32, i32) {
    %c0_i32 = arith.constant 0 : i32
    %c0_i32_0 = arith.constant 0 : i32
    %c0_i32_1 = arith.constant 0 : i32
    return %arg1, %c0_i32, %c0_i32_0 : i32, i32, i32
  }
  func.func @transform_5(%arg0: i32, %arg1: i32, %arg2: i32) -> (i32, i32, i32) {
    %c0_i32 = arith.constant 0 : i32
    %c0_i32_0 = arith.constant 0 : i32
    %c0_i32_1 = arith.constant 0 : i32
    return %arg1, %c0_i32, %c0_i32_0 : i32, i32, i32
  }
  func.func @transform_6(%arg0: i32, %arg1: i32, %arg2: i32) -> (i32, i32, i32) {
    %c0_i32 = arith.constant 0 : i32
    %c0_i32_0 = arith.constant 0 : i32
    %c0_i32_1 = arith.constant 0 : i32
    return %arg1, %c0_i32, %c0_i32_0 : i32, i32, i32
  }
  func.func @transform_7(%arg0: i32, %arg1: i32, %arg2: i32) -> (i32, i32, i32) {
    %c0_i32 = arith.constant 0 : i32
    %c0_i32_0 = arith.constant 0 : i32
    %c0_i32_1 = arith.constant 0 : i32
    return %arg1, %c0_i32, %c0_i32_0 : i32, i32, i32
  }
  func.func @transform_8(%arg0: i32, %arg1: i32, %arg2: i32) -> (i32, i32) {
    %c0_i32 = arith.constant 0 : i32
    %c0_i32_0 = arith.constant 0 : i32
    %c0_i32_1 = arith.constant 0 : i32
    return %c0_i32, %c0_i32_0 : i32, i32
  }
  func.func @transform_9(%arg0: i32, %arg1: i32, %arg2: i32) -> (i32, i32, i32) {
    %c0_i32 = arith.constant 0 : i32
    %c0_i32_0 = arith.constant 0 : i32
    %c0_i32_1 = arith.constant 0 : i32
    return %arg0, %c0_i32, %c0_i32_0 : i32, i32, i32
  }
}

</mosaic_0001>

<bundles_post_ra>
// kernel: tpu_custom_call.1
= control target key start
LH: loop header
LB: loop body
LE: loop exit
PB: predicated region body
PF: predicated region fallthrough
CT: control target
= control target key end

     0   :  { %s1632_s0 = inlined_call_operand.vmem [shape: f32[2,8,32], index: 0, kind: input, shape index: {}]   ;;  %s1633_s1 = inlined_call_operand.vmem [shape: bf16[4,32,8], index: 1, kind: input, shape index: {}]   ;;  %s1634_s2 = inlined_call_operand.vmem [shape: bf16[4,32,8], index: 2, kind: input, shape index: {}]   ;;  %s1635_s3 = inlined_call_operand.vmem [shape: bf16[4,32,8], index: 3, kind: input, shape index: {}]   ;;  %s1636_s4 = inlined_call_operand.vmem [shape: f32[4,1,8], index: 4, kind: input, shape index: {}]   ;;  %s1637_s5 = inlined_call_operand.vmem [shape: f32[4,1,8], index: 5, kind: input, shape index: {}]   ;;  %s1638_s6 = inlined_call_operand.vmem [shape: f32[4,1,8], index: 6, kind: input, shape index: {}]   ;;  %s1639_s7 = inlined_call_operand.vmem [shape: bf16[4,8,32], index: 7, kind: input, shape index: {}]   ;;  %s1640_s8 = inlined_call_operand.vmem [shape: f32[1,32], index: 8, kind: input, shape index: {}]   ;;  %s1641_s9 = inlined_call_operand.hbm [shape: f32[2,8,32], index: 9, kind: output, shape index: {}]  }
   0x1   :  { %1654 = sst [smem:[#allocation19_spill]] %s1632_s0 }
   0x2   :  { %1655 = sst [smem:[#allocation20_spill]] %s1633_s1 }
   0x3   :  { %1656 = sst [smem:[#allocation21_spill]] %s1634_s2 }
   0x4   :  { %1657 = sst [smem:[#allocation22_spill]] %s1641_s9 }
   0x5   :  { %14 = vsyncpa [#allocation7], 0 }
   0x6   :  { %16 = vsyncpa [#allocation7 + $0x1], 0  ;;  %s1391_s30 = smov 0   ;;  %s1393_s10 = smov 0  }
   0x7   :  { %s1395_s11 = smov 0   ;;  %s1397_s12 = smov 0  }
   0x8   :  { %s1399_s13 = smov 0   ;;  %s1401_s14 = smov 0  }
   0x9   :  { %s1403_s15 = smov 0   ;;  %s1405_s16 = smov 0  }
   0xa LB: > { %1658 = sst [smem:[#allocation9_spill]] %s1306_s30  ;;  %s1055_s17 = sadd.s32 4294967295, %s1334_s16   ;;  %s1334_s16 = sphi %s1405_s16, %s22_s16   ;;  %s1330_s15 = sphi %s1403_s15, %s1684_s15   ;;  %s1326_s14 = sphi %s1401_s14, %s1683_s14   ;;  %s1322_s13 = sphi %s1399_s13, %s1682_s13   ;;  %s1318_s12 = sphi %s1397_s12, %s1681_s12   ;;  %s1314_s11 = sphi %s1395_s11, %s1680_s11   ;;  %s1310_s10 = sphi %s1393_s10, %s1686_s10   ;;  %s1306_s30 = sphi %s1391_s30, %s1685_s30  }
   0xb   : > { %1659 = sst [smem:[#allocation10_spill]] %s1314_s11  ;;  %s1056_s18 = sadd.s32 4294967294, %s1334_s16  }
   0xc   : > { %1660 = sst [smem:[#allocation11_spill]] %s1326_s14  ;;  %s37_s19 = sadd.s32 1, %s1326_s14 }
   0xd   : > { %1661 = sst [smem:[#allocation12_spill]] %s1330_s15  ;;  %p39_p0 = scmp.ge.s32.totalorder %s37_s19, 4 }
   0xe   : > { %1662 = sst [smem:[#allocation13_spill]] %s1334_s16  ;;  %s41_s20 = sadd.s32 1, %s1330_s15 }
   0xf   : > { %p287_p1 = scmp.ne.s32.totalorder %s1314_s11, %s1310_s10  ;;  %p288_p2 = scmp.eq.s32.totalorder %s1055_s17, 7 }
  0x10   : > { %s1688_s19 = smov (%p39_p0, %s37_s19), 0  ;;  %s1690_s20 = smov (!%p39_p0, %s41_s20), %s1330_s15 }
  0x11   : > { %1663 = sst [smem:[#allocation14_spill]] %s1688_s19  ;;  %p1440_p3 = por %p288_p2, %p287_p1 }
  0x12   : > { %p293_p4 = scmp.ne.s32.totalorder %s1310_s10, %s1306_s30  ;;  %p43_p5 = scmp.ge.s32.totalorder %s1690_s20, 2 }
  0x13   : > { %s1664_s21 = scalar_select %p1440_p3, 1, 0 }
  0x14   : > { %p294_p6 = scmp.eq.s32.totalorder %s1056_s18, 7  ;;  %p1059_p7 = scmp.ge.s32.totalorder %s1334_s16, 1 }
  0x15   : > { %1665 = sst [smem:[#allocation15_spill]] %s1664_s21  ;;  %p371_p8 = scmp.lt.s32.totalorder %s1334_s16, 9 }
  0x16   : > { %s1692_s20 = smov (%p43_p5, %s1690_s20), 0  ;;  %p1450_p9 = por %p294_p6, %p293_p4 }
  0x17   : > { %1666 = sst [smem:[#allocation16_spill]] %s1692_s20  ;;  %p372_p10 = pnand %p1059_p7, %p371_p8 }
  0x18   : > { %s1667_s22 = scalar_select %p1450_p9, 1, 0 }
  0x19   : > { %s274_s23 = ssub.s32 %s1330_s15, %s1692_s20  ;;  %s277_s24 = sadd.s32 1, %s1314_s11 }
  0x1a   : > { %1668 = sst [smem:[#allocation17_spill]] %s1667_s22  ;;  %p275_p11 = scmp.eq.s32.totalorder %s274_s23, 0 }
  0x1b   : > { %375 = sbr.rel (%p372_p10) target bundleno = 1301 (0x515), region = 56  ;;  %s1644_s26 = sand.u32 (!%p372_p10), 1, %s1310_s10  }
  0x1c   : > { %s1458_s25 = scalar_select %p275_p11, %s1314_s11, %s277_s24  }
  0x1d   : > { %p434_p12 = scmp.lt.s32.totalorder (!%p372_p10), %s1322_s13, 1  ;;  %s1060_s27 = sshll.u32 (!%p372_p10), %s1644_s26, 3 }
  0x1e   : > { %1669 = sst [smem:[#allocation18_spill]] %s1458_s25  ;;  %p438_p13 = scmp.lt.s32.totalorder (!%p372_p10), %s1318_s12, 3 }
  0x1f   : > { %p467_p0 = scmp.eq.s32.totalorder (!%p372_p10), %s1318_s12, 0  ;;  %s1670_s0 = sld [smem:[#allocation19_spill]] (!%p372_p10) }
  0x20   : > { %s1671_s1 = sld [smem:[#allocation20_spill]] (!%p372_p10)  ;;  %s1672_s2 = sld [smem:[#allocation21_spill]] (!%p372_p10) }
  0x21   : > { %s1503_s30 = scalar_lea.vmem (!%p372_p10), [#allocation6], %s1060_s27 }
  0x22   : > { %s435_s28 = scalar_select %p434_p12, %s1322_s13, 1 }
  0x23   : > { %s1468_s29 = scalar_select %p438_p13, %s1318_s12, 3 }
  0x24   : > { %s1061_s17 = sshll.u32 %s435_s28, 3  ;;  %472 = sbr.rel (!%p467_p0) target bundleno = 43 (0x2b), region = 60  ;;  %v1070_v0 = vld [vmem:[%s1640_s8] ss:$0 sm:$0xff] (%p467_p0)  ;;  %vm480_vm0 = vcmask (%p467_p0), 261120  }
  0x25   : > { %s437_s24 = scalar_lea.vmem %s1670_s0, %s1061_s17  ;;  %s1090_s20 = sshll.u32 %s1468_s29, 4  ;;  %481 = vst.msk [vmem:[%s1503_s30] sm:$0xff] (%p467_p0), %vm480_vm0, %v1070_v0 }
  0x26   : > { %s442_s26 = scalar_lea.vmem %s1671_s1, %s1090_s20  ;;  %s447_s11 = scalar_lea.vmem %s1672_s2, %s1090_s20 }
  0x27   : > { %s1483_s16 = scalar_lea.vmem %s1635_s3, %s1090_s20  ;;  %s455_s21 = scalar_lea.vmem %s1636_s4, %s1468_s29 }
  0x28   : > { %s458_s23 = scalar_lea.vmem %s1637_s5, %s1468_s29  ;;  %s461_s19 = scalar_lea.vmem %s1638_s6, %s1468_s29 }
  0x29   : > { %s1068_s1 = sshll.u32 %s1468_s29, 2 }
  0x2a   : > { %s1501_s2 = scalar_lea.vmem %s1639_s7, %s1068_s1 }
  0x2b PF: > { %v1228_v1 = vld [vmem:[%s442_s26] sm:$0xff]   ;;  %v1336_v2 = vmov 0.0   ;;  %v1230_v4 = vld [vmem:[%s442_s26 + $0x8] sm:$0xff]   ;;  %vm1337_vm1 = vmmov 0   ;;  %vm515_vm2 = vcmask 261120   ;;  %vm488_vm3 = vcmask 64512  }
  0x2c   : > { %1109 = vmatprep.subr.bf16.mxu0 %v1336_v2  ;;  %1117 = vmatprep.subr.bf16.mxu1 %v1336_v2  ;;  %v1229_v3 = vld [vmem:[%s447_s11] sm:$0xff]   ;;  %v1231_v5 = vld [vmem:[%s447_s11 + $0x8] sm:$0xff]   ;;  %489 = vst.msk [vmem:[#allocation5] sm:$0xff] %vm488_vm3, %v1336_v2  ;;  %vm560_vm4 = vcmask 60416   ;;  %vm485_vm5 = vcmask 7168   ;;  %v1338_v31 = vmov -inf  }
  0x2d   : > { %1110 = vmatpush3.bf16.msra.mxu0 %v1228_v1  ;;  %1113 = vmatprep.mubr.msk.bf16.mxu0 %vm1337_vm1, %v1336_v2  ;;  %v490_v6 = vld [vmem:[%s437_s24] sm:$0xff]  ;;  %v1233_v25 = vld [vmem:[%s1483_s16 + $0x8] sm:$0xff]   ;;  %486 = vst.msk [vmem:[#allocation3] sm:$0xff] %vm485_vm5, %v1338_v31  ;;  %487 = vst.msk [vmem:[#allocation4] sm:$0xff] %vm485_vm5, %v1336_v2  ;;  %v1339_v32 = vmov 0   ;;  %vm781_vm6 = vcmask 1043456  }
  0x2e   : > { %1118 = vmatpush3.bf16.msra.mxu1 %v1229_v3  ;;  %1111 = vmatprep.subr.bf16.mxu0 %v1336_v2  ;;  %v491_v7 = vpack.c.bf16 %v490_v6, %v490_v6  ;;  %v1071_v8 = vld [vmem:[%s455_s21] ss:$0 sm:$0xff]  ;;  %s1087_s22 = sshll.u32 %s1322_s13, 7  ;;  %s905_s26 = sshll.u32 %s1503_s30, 4  ;;  %s1577_s26 = int_to_ptr.vmem [resolvable:$true] %s905_s26 }
  0x2f   : > { %1119 = vmatprep.subr.bf16.mxu1 %v1336_v2  ;;  %1121 = vmatprep.mubr.msk.bf16.mxu1 %vm1337_vm1, %v1336_v2  ;;  %v1075_v9 = vld [vmem:[%s458_s23] ss:$0 sm:$0xff]  ;;  %s1674_s24 = sld [smem:[#allocation22_spill]]  ;;  %s1675_s18 = sand.u32 1, %s1310_s10  }
  0x30   : > { %v1232_v24 = vld [vmem:[%s1483_s16] sm:$0xff]   ;;  %1226 = vset.pattern.permute.xlu0 %v1339_v32  ;;  %1227 = vset.pattern.permute.xlu1 %v1339_v32  ;;  %s892_s13 = scalar_lea.sflag [#allocation7], %s1675_s18  ;;  %s1240_s17 = scalar_lea.vmem %s1577_s26, 128 }
  0x31   : > { %1112 = vmatpush3.bf16.msra.mxu0 %v1230_v4  ;;  %v1079_v37 = vld [vmem:[%s461_s19] ss:$0 sm:$0xff]  ;;  %p1241_p1 = scmp.ne.s32.totalorder %s1577_s26, %s1240_s17  ;;  %s1340_s23 = smov [#allocation6]  }
  0x32   : > { %1120 = vmatpush3.bf16.msra.mxu1 %v1231_v5  ;;  %1125 = vmatprep.subr.bf16.mxu0 %v1336_v2  ;;  %v841_v53 = vld [vmem:[%s1501_s2] sm:$0xf]  ;;  %s1244_s15 = sshll.u32 %s1340_s23, 4  ;;  %s1245_s15 = int_to_ptr.vmem [resolvable:$false] %s1244_s15 }
  0x33   : > { %1133 = vmatprep.subr.bf16.mxu1 %v1336_v2  ;;  %v846_v54 = vsel %vm781_vm6, %v841_v53, 0  ;;  %v769_v61 = vld [vmem:[#allocation5] sm:$0xff]  ;;  %p1242_p2 = pnand %p1241_p1, %p1440_p3  ;;  %s1246_s19 = scalar_lea.vmem %s1245_s15, 256 }
  0x34   : > { %1114 = vmatmul.mubr.msk.bf16.vlgmr.msra.gmra.mrb[0].mxu0 %vm515_vm2, %v491_v7  ;;  %v745_v33 = vld [vmem:[#allocation3] sm:$0xff]  ;;  %v761_v55 = vld [vmem:[#allocation4] sm:$0xff]  ;;  %p1247_p5 = scmp.lt.s32.totalorder %s1577_s26, %s1245_s15  ;;  %p1248_p6 = scmp.lt.s32.totalorder %s1246_s19, %s1240_s17 }
  0x35   : > { %1122 = vmatmul.mubr.msk.bf16.vlgmr.msra.gmra.mrb[0].mxu1 %vm515_vm2, %v491_v7  ;;  %1129 = vmatprep.mubr.msk.bf16.mxu0 %vm1337_vm1, %v1336_v2  ;;  %s1575_s28 = scalar_lea.hbm %s1674_s24, %s1087_s22  ;;  %p1243_p4 = pneg %p1242_p2 }
  0x36   : > { %1135 = vmatprep.mubr.msk.bf16.mxu1 %vm1337_vm1, %v1336_v2  ;;  %1126 = vmatpush3.bf16.msra.mxu0 %v1232_v24  ;;  %p1249_p7 = por %p1248_p6, %p1247_p5 }
  0x37   : > { %1127 = vmatprep.subr.bf16.mxu0 %v1336_v2 }
  0x38   : > { %p1250_p8 = pnand %p1249_p7, %p1243_p4 }
  0x3a   : > { %1128 = vmatpush3.bf16.msra.mxu0 %v1233_v25 }
  0x3b   : > { %1139 = vmatprep.subr.bf16.mxu0 %v1336_v2 }
  0x3d   : > { %1130 = vmatmul.mubr.msk.bf16.vlgmr.msra.gmra.mrb[4].mxu0 %vm515_vm2, %v491_v7 }
  0x3e   : > { %1141 = vmatprep.mubr.msk.bf16.mxu0 %vm1337_vm1, %v1336_v2 }
 0x107   : > { %v553_v10 = vpop.f32.mrb[0].mxu0 }
 0x108   : > { %v554_v11 = vadd.f32 %v1071_v8, %v553_v10  ;;  %v627_v12 = vpop.f32.mrb[0].mxu1  ;;  %v1115_v13 = vpop.f32.mrb[1].mxu0 }
 0x109   : > { %v628_v14 = vadd.f32 %v1075_v9, %v627_v12  ;;  %v1123_v15 = vpop.f32.mrb[1].mxu1  ;;  %v556_v16 = vpop.f32.mrb[2].mxu0  ;;  %v888_v9 = vld [vmem:[%s1503_s30] sm:$0xff] }
 0x10a   : > { %v559_v17 = vpack.c.bf16 %v554_v11, %v554_v11  ;;  %v630_v18 = vpop.f32.mrb[2].mxu1  ;;  %v1116_v19 = vpop.f32.mrb[3].mxu0 }
 0x10b   : > { %v697_v20 = vpack.c.bf16 %v628_v14, %v628_v14  ;;  %v1124_v21 = vpop.f32.mrb[3].mxu1 }
 0x10c   : > { %561 = vst.msk [vmem:[#allocation2] sm:$0xf] %vm560_vm4, %v559_v17 }
 0x10d   : > { %v703_v22 = vsel %vm488_vm3, %v697_v20, 0 }
 0x10e   : > { %1134 = vmatpush3.bf16.xpose.msra.mxu1 %v703_v22 }
 0x10f   : > { %1145 = vmatprep.subr.bf16.mxu1 %v1336_v2 }
 0x110   : > { %v690_v38 = vpop.f32.mrb[4].mxu0 }
 0x111   : > { %v691_v39 = vadd.f32 %v1079_v37, %v690_v38  ;;  %v1131_v40 = vpop.f32.mrb[5].mxu0 }
 0x112   : > { %v693_v41 = vpop.f32.mrb[6].mxu0 }
 0x113   : > { %v696_v23 = vld [vmem:[#allocation2] sm:$0xf]  ;;  %v777_v42 = vpack.c.bf16 %v691_v39, %v691_v39  ;;  %v1132_v43 = vpop.f32.mrb[7].mxu0 }
 0x115   : > { %1136 = vmatmul.mubr.msk.bf16.vlgmr.msra.gmra.mrb[4].mxu1 %vm488_vm3, %v696_v23  ;;  %v783_v44 = vsel %vm781_vm6, %v777_v42, 0 }
 0x116   : > { %1147 = vmatprep.mubr.msk.bf16.mxu1 %vm1337_vm1, %v1336_v2  ;;  %1140 = vmatpush3.bf16.msra.mxu0 %v783_v44 }
 0x117   : > { %1146 = vmatpush3.bf16.msra.mxu1 %v846_v54 }
 0x1e8   : > { %v739_v26 = vpop.f32.mrb[4].mxu1 }
 0x1e9   : > { %v1137_v27 = vpop.f32.mrb[5].mxu1  ;;  %v746_v28 = vsel %vm488_vm3, %v739_v26, -inf }
 0x1ea   : > { %747 = vmax.xlane.f32.xlu0 %v746_v28  ;;  %v742_v29 = vpop.f32.mrb[6].mxu1 }
 0x1eb   : > { %v1138_v30 = vpop.f32.mrb[7].mxu1 }
 0x277   : > { %v748_v34 = vpop.xlane.xlu0 %747 }
 0x278   : > { %v749_v35 = vmax.f32 %v745_v33, %v748_v34 }
 0x27a   : > { %v750_v36 = vsub.f32 %v745_v33, %v749_v35  ;;  %827 = vst.msk [vmem:[#allocation3] sm:$0xff] %vm485_vm5, %v749_v35  ;;  %755 = vperm.xlu0 %1226, %v749_v35  }
 0x27c   : > { %v751_v51 = vmul.f32 1.442695, %v750_v36 }
 0x2f9   : > { %v756_v45 = vpop.permute.xlu0 %755 }
 0x2fa   : > { %v758_v46 = vsub.f32 %v739_v26, %v756_v45 }
 0x2fc   : > { %v759_v47 = vmul.f32 1.442695, %v758_v46 }
 0x2fe   : > { %1234 = vpow2.f32 %v759_v47 }
 0x2ff   : > { %1236 = vpow2.f32 %v751_v51 }
 0x308   : > { %v1235_v48 = vpop.eup %1234 }
 0x309   : > { %v763_v49 = vsel %vm488_vm3, %v1235_v48, 0.0  ;;  %v776_v50 = vpack.c.bf16 %v1235_v48, %v1235_v48  ;;  %v1237_v52 = vpop.eup %1236 }
 0x30a   : > { %764 = vadd.xlane.f32.xlu1 %v763_v49  ;;  %v762_v56 = vmul.f32 %v1237_v52, %v761_v55 }
 0x30b   : > { %1142 = vmatmul.mubr.msk.bf16.vlgmr.msra.gmra.mrb[8].mxu0 %vm488_vm3, %v776_v50 }
 0x31b   : > { %772 = vperm.xlu1 %1227, %v1237_v52  }
 0x397   : > { %v765_v57 = vpop.xlane.xlu1 %764 }
 0x398   : > { %v766_v58 = vadd.f32 %v765_v57, %v762_v56 }
 0x39a   : > { %768 = vst.msk [vmem:[#allocation4] sm:$0xff] %vm485_vm5, %v766_v58 }
 0x39b   : > { %v773_v62 = vpop.permute.xlu1 %772 }
 0x39c   : > { %v775_v63 = vmul.f32 %v773_v62, %v769_v61 }
 0x3a1   : > { %v832_v59 = vld [vmem:[#allocation4] sm:$0xff] }
 0x3a2   : > { %1238 = vrcp.f32 %v832_v59 }
 0x3ac   : > { %v1239_v60 = vpop.eup %1238 }
 0x3ad   : > { %836 = vperm.xlu1 %1227, %v1239_v60  }
 0x3de   : > { %v819_v0 = vpop.f32.mrb[8].mxu0 }
 0x3df   : > { %v825_v1 = vadd.f32 %v819_v0, %v775_v63  ;;  %v1143_v2 = vpop.f32.mrb[9].mxu0 }
 0x3e0   : > { %v822_v3 = vpop.f32.mrb[10].mxu0 }
 0x3e1   : > { %826 = vst.msk [vmem:[#allocation5] sm:$0xff] %vm488_vm3, %v825_v1  ;;  %v1144_v4 = vpop.f32.mrb[11].mxu0 }
 0x3e8   : > { %v831_v5 = vld [vmem:[#allocation5] sm:$0xff] }
 0x42c   : > { %v837_v6 = vpop.permute.xlu1 %836 }
 0x42d   : > { %v839_v7 = vmul.f32 %v837_v6, %v831_v5 }
 0x42f   : > { %v840_v8 = vpack.c.bf16 %v839_v7, %v839_v7 }
 0x431   : > { %1148 = vmatmul.mubr.msk.bf16.vlgmr.msra.gmra.mrb[8].mxu1 %vm488_vm3, %v840_v8 }
 0x504   : > { %v882_v10 = vpop.f32.mrb[8].mxu1 }
 0x505   : > { %v889_v11 = vadd.f32 %v888_v9, %v882_v10  ;;  %v1149_v12 = vpop.f32.mrb[9].mxu1 }
 0x506   : > { %v885_v13 = vpop.f32.mrb[10].mxu1 }
 0x507   : > { %890 = vst.msk [vmem:[%s1503_s30] sm:$0xff] %vm515_vm2, %v889_v11  ;;  %v1150_v14 = vpop.f32.mrb[11].mxu1 }
 0x508   : > { %1253 = shalt.err (!%p1250_p8)
}
 0x509   : > { %s1254_s14 = scalar_lea.hbm %s1575_s28, 128  ;;  %s1258_s9 = scalar_lea.hbm %s1674_s24, 256 }
 0x50a   : > { %p1255_p10 = scmp.ne.s32.totalorder %s1575_s28, %s1254_s14  ;;  %p1259_p13 = scmp.lt.u32.totalorder %s1575_s28, %s1674_s24 }
 0x50b   : > { %p1260_p0 = scmp.lt.u32.totalorder %s1258_s9, %s1254_s14  ;;  %p1262_p2 = scmp.lt.u32.totalorder %s1254_s14, %s1575_s28 }
 0x50c   : > { %p1256_p11 = pnand %p1255_p10, %p1440_p3 }
 0x50d   : > { %p1261_p1 = por %p1260_p0, %p1259_p13 }
 0x50e   : > { %p1257_p12 = pneg %p1256_p11 }
 0x50f   : > { %p1263_p4 = por %p1262_p2, %p1261_p1 }
 0x511   : > { %p1264_p5 = pnand %p1263_p4, %p1257_p12 }
 0x513   : > { %1267 = shalt.err (!%p1264_p5)
}
 0x514   : > { %1151 = dma.vmem_to_hbm [thread:$0]  (%p1440_p3), %s1577_s26, 128, %s1575_s28, %s892_s13  }
 0x515 PF: > { %s1676_s1 = sld [smem:[#allocation13_spill]]  ;;  %s1677_s11 = sld [smem:[#allocation9_spill]] }
 0x51b   : > { %p1157_p6 = scmp.ge.s32.totalorder %s1676_s1, 2  ;;  %s917_s16 = sand.u32 1, %s1677_s11  }
 0x51c   : > { %s918_s21 = scalar_lea.sflag [#allocation7], %s917_s16 }
 0x51d   : > { %p1154_p7 = pnand %p1157_p6, %p1450_p9 }
 0x51f   : > { %1301 = dma.done.wait (!%p1154_p7), %s918_s21, 128  }
 0x520   : > { %1303 = vsyncadd (!%p1154_p7), %s918_s21, 4294967168  ;;  %s22_s16 = sadd.s32 1, %s1676_s1   ;;  %s1679_s22 = sld [smem:[#allocation10_spill]] }
 0x521   : > { %p19_p8 = scmp.ge.s32.totalorder %s22_s16, 10   ;;  %s1680_s11 = sld [smem:[#allocation18_spill]] }
 0x522   : > { %s1681_s12 = sld [smem:[#allocation11_spill]]  ;;  %s1682_s13 = sld [smem:[#allocation12_spill]] }
 0x523   : > { %s1683_s14 = sld [smem:[#allocation14_spill]]  ;;  %s1684_s15 = sld [smem:[#allocation16_spill]] }
 0x524   : > { %s1685_s30 = smov %s1310_s10  ;;  %21 = sbr.rel (!%p19_p8) target bundleno = 10 (0xa), region = 125 }
 0x526   : > { %s1686_s10 = smov %s1679_s22 }
 0x52b   :  { %923 = vsyncpa [#allocation7], 1 }
 0x52c   :  { %925 = vsyncpa [#allocation7 + $0x1], 1 }

</bundles_post_ra>
